<compile_context>
chip_gen: v5e
topology: v5e:2x2
jax: 0.10.0
libtpu: 0.0.40
codegen_flags: <defaults>
</compile_context>

<pallas_src>
import functools
import math

import jax
import jax.numpy as jnp
from jax.experimental import pallas as pl
from jax.experimental.pallas import tpu as pltpu

_LN_EPS = 1e-5
_INV_SQRT2 = 1.0 / math.sqrt(2.0)
_MASK_NEG = -1e30          # finite "-inf": avoids inf-inf NaN hazards in the online softmax
_MIB = 1024 * 1024
_TARGET_ROWS = 4096        # soft target for Bt*St MXU rows when choosing a sequence tile


def _attention_pool_kernel(x_ref, mask_ref, w1_ref, vecs_ref, b2_ref,
                           out_ref, m_sc, l_sc, acc_sc, *, approximate_gelu):
    """One (batch-block, seq-tile) grid step.

    x_ref:    (Bt, St, H)  hidden states (caller dtype; bf16 callers stay bf16 in VMEM)
    mask_ref: (1, Bt, St)  attention mask tile as float32 (0 => masked)
    w1_ref:   (H, H) bf16  first Linear weight, applied as x @ w1 (== torch W1^T)
    vecs_ref: (4, H) f32   rows: [b1, ln_gamma, ln_beta, w2]
    b2_ref:   (1,)   f32   second Linear bias (SMEM)
    out_ref:  (1, Bt, H)   pooled embeddings (f32), written on the last sequence tile
    m_sc / l_sc / acc_sc:  online-softmax running max / denominator / weighted-sum scratch
    """
    sj = pl.program_id(1)

    @pl.when(sj == 0)
    def _():
        m_sc[...] = jnp.full_like(m_sc, -jnp.inf)
        l_sc[...] = jnp.zeros_like(l_sc)
        acc_sc[...] = jnp.zeros_like(acc_sc)

    bt, st, h = x_ref.shape
    x = x_ref[...]                              # caller dtype; no eager f32 materialization

    vecs = vecs_ref[...]
    b1 = vecs[0:1, :]
    gamma = vecs[1:2, :]
    beta = vecs[2:3, :]
    w2 = vecs[3:4, :]

    # ---- Linear(H, H): one (Bt*St, H) @ (H, H) MXU pass, bf16 inputs / f32 accumulate.
    a = jnp.dot(x.reshape(bt * st, h).astype(jnp.bfloat16), w1_ref[...],
                preferred_element_type=jnp.float32) + b1

    # ---- LayerNorm (biased variance, eps=1e-5 -- PyTorch semantics), f32.
    mu = jnp.mean(a, axis=-1, keepdims=True)
    d = a - mu
    var = jnp.mean(d * d, axis=-1, keepdims=True)
    a = d * jax.lax.rsqrt(var + _LN_EPS) * gamma + beta

    # ---- GELU: tanh approximation (EUP) by default; exact erf optionally.
    if approximate_gelu:
        a = jax.nn.gelu(a, approximate=True)
    else:
        a = 0.5 * a * (1.0 + jax.lax.erf(a * _INV_SQRT2))

    # ---- Linear(H, 1): VPU multiply + lane reduction (avoids an N=1 MXU pass).
    logits = jnp.sum(a.reshape(bt, st, h) * w2, axis=-1) + b2_ref[0]       # (Bt, St)

    # ---- mask + online softmax over the sequence axis (flash-attention style).
    mask = mask_ref[0]                                                     # (Bt, St)
    logits = jnp.where(mask == 0.0, _MASK_NEG, logits)
    m_prev = m_sc[...]                                                     # (Bt, 1)
    m_new = jnp.maximum(m_prev, jnp.max(logits, axis=-1, keepdims=True))
    alpha = jnp.exp(m_prev - m_new)                                        # 0 on the first tile
    p = jnp.exp(logits - m_new)                                            # (Bt, St) f32
    l_sc[...] = alpha * l_sc[...] + jnp.sum(p, axis=-1, keepdims=True)
    # Weighted partial sum over this seq tile; x promotes to f32 per-vreg in the multiply.
    acc_sc[...] = alpha * acc_sc[...] + jnp.sum(p[:, :, None] * x, axis=1)
    m_sc[...] = m_new

    @pl.when(sj == pl.num_programs(1) - 1)
    def _():
        r = pl.reciprocal(l_sc[...], approx=True)
        r = r * (2.0 - l_sc[...] * r)            # one Newton step -> ~f32 accuracy
        out_ref[0] = acc_sc[...] * r


def _tpu_vmem_capacity_bytes():
    """Best-effort physical VMEM query; conservative (v7x per-core) default if unavailable."""
    try:
        cap = getattr(pltpu.get_tpu_info(), "vmem_capacity_bytes", None)
        if cap:
            return int(cap)
    except Exception:       # hardware probe only -- never masks kernel/compile errors
        pass
    return 64 * _MIB


def _largest_s_tile(S, upper):
    """Largest multiple of 128 that divides S and is <= upper (caller ensures S % 128 == 0)."""
    best, cand = 128, 128
    while cand <= upper:
        if S % cand == 0:
            best = cand
        cand += 128
    return best


def _plan(B, S, H, x_itemsize, block_override=None):
    """Pick (Bt, St), grid, padded B and the scoped-VMEM limit for this TPU generation."""
    cap = _tpu_vmem_capacity_bytes()
    num_tc = 2 if cap <= 64 * _MIB else 1            # v7x: 64 MiB/TC & 2 TCs; v5e/v6e: 128 MiB, 1 TC
    vmem_limit = max(32 * _MIB, min(cap - 8 * _MIB, int(0.85 * cap)))
    budget = max(16 * _MIB, vmem_limit - 16 * _MIB)  # planning budget: leave compiler headroom

    const_bytes = 2 * (2 * H * H) + 2 * (4 * H * 4) + (64 << 10)  # 2x-buffered bf16 w1 + vecs
    per_row = H * (2 * x_itemsize + 12)      # double-buffered x row + f32 matmul/LN/GELU chain
    per_brow = 2 * 512 + 12 * H              # per batch row: (Bt,1) scratch lane pad + acc + out
    avail = max(0, budget - const_bytes)

    if block_override is not None:
        bt, St = block_override
    else:
        St = S
        if avail >= S * per_row + per_brow:
            # Whole sequence fits: batch-block; the VMEM budget binds Bt (no fixed row target).
            bt = max(1, min(B, avail // (S * per_row + per_brow)))
            if num_tc >= 2 and B > 1:
                bt = min(bt, -(-B // 2))     # keep >= 2 batch steps so both TensorCores get work
            if -(-B // bt) == 1 and S % 128 == 0 and S >= 256:
                # A single grid step has zero DMA/compute overlap -> S-tile to restore pipelining.
                upper = min(S // 2, max(128, (_TARGET_ROWS // bt) // 128 * 128))
                St = _largest_s_tile(S, upper)
        else:
            # Even one full-S batch row does not fit: S-tile with Bt=1 (online softmax).
            bt = 1
            if S % 128 == 0 and S >= 256:
                rows_max = max(128, avail // per_row)
                St = _largest_s_tile(S, min(S, (rows_max // 128) * 128))
            # else: keep St = S (see TODO about padding S).

    gB = -(-B // bt)
    gS = S // St
    return bt, St, gB, gS, gB * bt, int(vmem_limit)


def _build_call(S, H, bt, St, gB, gS, vmem_limit, approximate_gelu):
    const_map = lambda i, j: (0, 0)
    grid_spec = pltpu.PrefetchScalarGridSpec(
        num_scalar_prefetch=0,
        grid=(gB, gS),
        in_specs=[
            pl.BlockSpec((bt, St, H), lambda i, j: (i, j, 0)),      # x
            pl.BlockSpec((1, bt, St), lambda i, j: (i, 0, j)),      # mask
            pl.BlockSpec((H, H), const_map),                        # w1 (bf16)
            pl.BlockSpec((4, H), const_map),                        # [b1, gamma, beta, w2]
            pl.BlockSpec(memory_space=pltpu.MemorySpace.SMEM),      # b2 scalar
        ],
        out_specs=pl.BlockSpec((1, bt, H), lambda i, j: (i, 0, 0)),
        scratch_shapes=[
            pltpu.VMEM((bt, 1), jnp.float32),    # running max
            pltpu.VMEM((bt, 1), jnp.float32),    # running denominator
            pltpu.VMEM((bt, H), jnp.float32),    # running weighted sum
        ],
    )
    return pl.pallas_call(
        functools.partial(_attention_pool_kernel, approximate_gelu=approximate_gelu),
        out_shape=jax.ShapeDtypeStruct((gB, bt, H), jnp.float32),
        grid_spec=grid_spec,
        compiler_params=pltpu.CompilerParams(
            dimension_semantics=("parallel", "arbitrary"),
            vmem_limit_bytes=int(vmem_limit),
        ),
    )


def attention_pooling(last_hidden_state, attention_mask, params, *,
                      approximate_gelu=True, block_override=None):
    """last_hidden_state: [B, S, H]; attention_mask: [B, S] (0/1). Returns [B, H] float32.

    approximate_gelu=True uses the tanh GELU (EUP path); False matches torch.nn.GELU() (erf).
    block_override=(Bt, St) bypasses the automatic tile planner (testing / tuning).
    NOTE: fully-masked rows yield uniform 1/S weights (the sequence mean) rather than NaN.
    """
    B, S, H = last_hidden_state.shape
    bt, St, gB, gS, B_pad, vmem_limit = _plan(
        B, S, H, last_hidden_state.dtype.itemsize, block_override)
    assert S % St == 0 and (St == S or St % 128 == 0), (S, St)

    x = last_hidden_state
    mask = attention_mask.astype(jnp.float32)
    if B_pad != B:
        x = jnp.pad(x, ((0, B_pad - B), (0, 0), (0, 0)))
        mask = jnp.pad(mask, ((0, B_pad - B), (0, 0)))      # padded rows fully masked
    mask = mask.reshape(gB, bt, S)

    w1 = params["w1"].astype(jnp.bfloat16)                  # (H, H), applied as x @ w1 (torch W^T)
    vecs = jnp.stack([params["b1"], params["gamma"], params["beta"],
                      params["w2"].reshape(H)], axis=0).astype(jnp.float32)   # (4, H)
    b2 = params["b2"].astype(jnp.float32).reshape(1)

    out = _build_call(S, H, bt, St, gB, gS, vmem_limit, approximate_gelu)(
        x, mask, w1, vecs, b2)
    return out.reshape(B_pad, H)[:B]


def attention_pooling_ref(last_hidden_state, attention_mask, params, *,
                          matmul_dtype=jnp.float32, approximate_gelu=False):
    """Pure-JAX reference mirroring the PyTorch forward."""
    x = last_hidden_state.astype(jnp.float32)
    h = jnp.dot(x.astype(matmul_dtype), params["w1"].astype(matmul_dtype),
                preferred_element_type=jnp.float32) + params["b1"]
    mu = jnp.mean(h, axis=-1, keepdims=True)
    var = jnp.mean((h - mu) ** 2, axis=-1, keepdims=True)
    h = (h - mu) * jax.lax.rsqrt(var + _LN_EPS) * params["gamma"] + params["beta"]
    h = jax.nn.gelu(h, approximate=approximate_gelu)
    w = h @ params["w2"] + params["b2"]                      # [B, S, 1]
    w = jnp.where(attention_mask[..., None] == 0, -jnp.inf, w)
    w = jax.nn.softmax(w, axis=1)
    return jnp.sum(w * x, axis=1)


def init_params(key, H):
    k1, k2, k3, k4 = jax.random.split(key, 4)
    s1 = 1.0 / math.sqrt(H)
    return {
        "w1": jax.random.uniform(k1, (H, H), jnp.float32, -s1, s1),
        "b1": jax.random.uniform(k2, (H,), jnp.float32, -s1, s1),
        "gamma": jnp.ones((H,), jnp.float32),
        "beta": jnp.zeros((H,), jnp.float32),
        "w2": jax.random.uniform(k3, (H, 1), jnp.float32, -s1, s1),
        "b2": jax.random.uniform(k4, (1,), jnp.float32, -s1, s1),
    }


def _verify(out, x, mask, params, approximate_gelu, tol_exact=1e-1):
    # Tight check vs. a reference with the same intentional precision choices
    # (bf16 first matmul, same GELU variant); loose sanity check vs. the exact-f32 forward.
    ref_match = attention_pooling_ref(x, mask, params, matmul_dtype=jnp.bfloat16,
                                      approximate_gelu=approximate_gelu)
    ref_exact = attention_pooling_ref(x, mask, params)
    assert out.shape == ref_exact.shape, (out.shape, ref_exact.shape)
    assert jnp.allclose(out, ref_match, atol=2e-3, rtol=2e-3)
    assert jnp.allclose(out, ref_exact, atol=tol_exact, rtol=tol_exact)


if __name__ == "__main__":
    key = jax.random.PRNGKey(0)

    # --- Test 1: small shape, automatic tile planning (B=2, S=8, H=32), f32 inputs.
    B, S, H = 2, 8, 32
    kx, kp, key = jax.random.split(key, 3)
    x1 = jax.random.normal(kx, (B, S, H), jnp.float32)
    m1 = jnp.ones((B, S), jnp.int32).at[1, 5:].set(0)          # trailing padding on row 1
    p1 = init_params(kp, H)
    out = jax.block_until_ready(attention_pooling(x1, m1, p1))
    _verify(out, x1, m1, p1, approximate_gelu=True)

    # Exact-erf GELU path (torch.nn.GELU() numerics) on the same inputs.
    out = jax.block_until_ready(attention_pooling(x1, m1, p1, approximate_gelu=False))
    _verify(out, x1, m1, p1, approximate_gelu=False)

    # --- Test 2: forced S-tiling -- exercises the online-softmax path (gS=2), bf16 inputs.
    B, S, H = 2, 256, 128
    kx, kp, key = jax.random.split(key, 3)
    x2 = jax.random.normal(kx, (B, S, H), jnp.float32).astype(jnp.bfloat16)
    m2 = jnp.ones((B, S), jnp.int32).at[0, 200:].set(0)
    p2 = init_params(kp, H)
    out = jax.block_until_ready(
        attention_pooling(x2, m2, p2, block_override=(1, 128)))
    _verify(out, x2, m2, p2, approximate_gelu=True)

    # --- Test 3: forced batch blocking with B padding (B=3 -> B_pad=4, Bt=2).
    B, S, H = 3, 8, 32
    kx, kp, key = jax.random.split(key, 3)
    x3 = jax.random.normal(kx, (B, S, H), jnp.float32)
    m3 = jnp.ones((B, S), jnp.int32).at[2, 3:].set(0)
    p3 = init_params(kp, H)
    out = jax.block_until_ready(
        attention_pooling(x3, m3, p3, block_override=(2, S)))
    _verify(out, x3, m3, p3, approximate_gelu=True)

    print("KERNEL_OK")
</pallas_src>

<mosaic_0001>
module attributes {stable_mosaic.version = 11 : i64} {
  func.func @_attention_pool_kernel(%arg0: i32, %arg1: i32, %arg2: memref<1x8x32xf32, #tpu.memory_space<vmem>>, %arg3: memref<1x1x8xf32, #tpu.memory_space<vmem>>, %arg4: memref<32x32xbf16, #tpu.memory_space<vmem>>, %arg5: memref<4x32xf32, #tpu.memory_space<vmem>>, %arg6: memref<1xf32, #tpu.memory_space<smem>>, %arg7: memref<1x1x32xf32, #tpu.memory_space<vmem>>, %arg8: memref<1x1xf32, #tpu.memory_space<vmem>>, %arg9: memref<1x1xf32, #tpu.memory_space<vmem>>, %arg10: memref<1x32xf32, #tpu.memory_space<vmem>>) attributes {dimension_semantics = [#tpu.dimension_semantics<parallel>, #tpu.dimension_semantics<arbitrary>], iteration_bounds = array<i64: 2, 1>, scalar_prefetch = 0 : i64, scratch_operands = 3 : i64, tpu.core_type = #tpu.core_type<tc>, window_params = [{transform_indices = @transform_0, window_bounds = array<i64: 1, 8, 32>}, {transform_indices = @transform_1, window_bounds = array<i64: 1, 1, 8>}, {pipeline_mode = #tpu.pipeline_mode<synchronous>, transform_indices = @transform_2, window_bounds = array<i64: 32, 32>}, {pipeline_mode = #tpu.pipeline_mode<synchronous>, transform_indices = @transform_3, window_bounds = array<i64: 4, 32>}, {transform_indices = @transform_4, window_bounds = array<i64: 1>}, {transform_indices = @transform_5, window_bounds = array<i64: 1, 1, 32>}]} {
    %c0_i32 = arith.constant 0 : i32
    %0 = arith.cmpi eq, %arg1, %c0_i32 : i32
    %1 = arith.extui %0 : i1 to i32
    %c0_i32_0 = arith.constant 0 : i32
    %2 = arith.cmpi ne, %1, %c0_i32_0 : i32
    scf.if %2 {
      %cst_40 = arith.constant 0xFF800000 : f32
      %90 = vector.broadcast %cst_40 : f32 to vector<1x1xf32>
      %c0_41 = arith.constant 0 : index
      %c0_42 = arith.constant 0 : index
      %91 = vector.load %arg8[%c0_41, %c0_42] : memref<1x1xf32, #tpu.memory_space<vmem>>, vector<1x1xf32>
      tpu.vector_store %arg8[%c0_41, %c0_42], %90 {strides = array<i32>} : memref<1x1xf32, #tpu.memory_space<vmem>>, vector<1x1xf32>,
      %cst_43 = arith.constant 0.000000e+00 : f32
      %92 = vector.broadcast %cst_43 : f32 to vector<1x1xf32>
      %c0_44 = arith.constant 0 : index
      %c0_45 = arith.constant 0 : index
      %93 = vector.load %arg9[%c0_44, %c0_45] : memref<1x1xf32, #tpu.memory_space<vmem>>, vector<1x1xf32>
      tpu.vector_store %arg9[%c0_44, %c0_45], %92 {strides = array<i32>} : memref<1x1xf32, #tpu.memory_space<vmem>>, vector<1x1xf32>,
      %cst_46 = arith.constant 0.000000e+00 : f32
      %94 = vector.broadcast %cst_46 : f32 to vector<1x32xf32>
      %c0_47 = arith.constant 0 : index
      %c0_48 = arith.constant 0 : index
      %95 = vector.load %arg10[%c0_47, %c0_48] : memref<1x32xf32, #tpu.memory_space<vmem>>, vector<1x32xf32>
      tpu.vector_store %arg10[%c0_47, %c0_48], %94 {strides = array<i32>} : memref<1x32xf32, #tpu.memory_space<vmem>>, vector<1x32xf32>,
    } else {
    }
    %c0 = arith.constant 0 : index
    %c0_1 = arith.constant 0 : index
    %c0_2 = arith.constant 0 : index
    %3 = vector.load %arg2[%c0, %c0_1, %c0_2] : memref<1x8x32xf32, #tpu.memory_space<vmem>>, vector<1x8x32xf32>
    %c0_3 = arith.constant 0 : index
    %c0_4 = arith.constant 0 : index
    %4 = vector.load %arg5[%c0_3, %c0_4] : memref<4x32xf32, #tpu.memory_space<vmem>>, vector<4x32xf32>
    %5 = vector.extract_strided_slice %4 {offsets = [0, 0], sizes = [1, 32], strides = [1, 1]} : vector<4x32xf32> to vector<1x32xf32>
    %6 = vector.extract_strided_slice %4 {offsets = [1, 0], sizes = [1, 32], strides = [1, 1]} : vector<4x32xf32> to vector<1x32xf32>
    %7 = vector.extract_strided_slice %4 {offsets = [2, 0], sizes = [1, 32], strides = [1, 1]} : vector<4x32xf32> to vector<1x32xf32>
    %8 = vector.extract_strided_slice %4 {offsets = [3, 0], sizes = [1, 32], strides = [1, 1]} : vector<4x32xf32> to vector<1x32xf32>
    %9 = vector.shape_cast %3 : vector<1x8x32xf32> to vector<8x32xf32>
    %10 = arith.truncf %9 : vector<8x32xf32> to vector<8x32xbf16>
    %c0_5 = arith.constant 0 : index
    %c0_6 = arith.constant 0 : index
    %11 = vector.load %arg4[%c0_5, %c0_6] : memref<32x32xbf16, #tpu.memory_space<vmem>>, vector<32x32xbf16>
    %cst = arith.constant dense<0.000000e+00> : vector<8x32xf32>
    %12 = tpu.matmul %10, %11, %cst {dimension_numbers = #tpu.dot_dimension_numbers<[1], [0], [0], [1], [0, 0, 1, 1], [], []>} : vector<8x32xbf16>, vector<32x32xbf16>, vector<8x32xf32> -> vector<8x32xf32>
    %13 = vector.broadcast %5 : vector<1x32xf32> to vector<8x32xf32>
    %14 = arith.addf %12, %13 : vector<8x32xf32>
    %cst_7 = arith.constant dense<0.000000e+00> : vector<8xf32>
    %15 = vector.multi_reduction <add>, %14, %cst_7 [1] : vector<8x32xf32> to vector<8xf32>
    %16 = vector.shape_cast %15 : vector<8xf32> to vector<8x1xf32>
    %cst_8 = arith.constant 3.200000e+01 : f32
    %17 = vector.broadcast %cst_8 : f32 to vector<8x1xf32>
    %18 = arith.divf %16, %17 : vector<8x1xf32>
    %19 = vector.broadcast %18 : vector<8x1xf32> to vector<8x32xf32>
    %20 = arith.subf %14, %19 : vector<8x32xf32>
    %21 = arith.mulf %20, %20 : vector<8x32xf32>
    %cst_9 = arith.constant dense<0.000000e+00> : vector<8xf32>
    %22 = vector.multi_reduction <add>, %21, %cst_9 [1] : vector<8x32xf32> to vector<8xf32>
    %23 = vector.shape_cast %22 : vector<8xf32> to vector<8x1xf32>
    %cst_10 = arith.constant 3.200000e+01 : f32
    %24 = vector.broadcast %cst_10 : f32 to vector<8x1xf32>
    %25 = arith.divf %23, %24 : vector<8x1xf32>
    %cst_11 = arith.constant 9.99999974E-6 : f32
    %26 = vector.broadcast %cst_11 : f32 to vector<8x1xf32>
    %27 = arith.addf %25, %26 : vector<8x1xf32>
    %28 = math.rsqrt %27 : vector<8x1xf32>
    %29 = vector.broadcast %28 : vector<8x1xf32> to vector<8x32xf32>
    %30 = arith.mulf %20, %29 : vector<8x32xf32>
    %31 = vector.broadcast %6 : vector<1x32xf32> to vector<8x32xf32>
    %32 = arith.mulf %30, %31 : vector<8x32xf32>
    %33 = vector.broadcast %7 : vector<1x32xf32> to vector<8x32xf32>
    %34 = arith.addf %32, %33 : vector<8x32xf32>
    %35 = arith.mulf %34, %34 : vector<8x32xf32>
    %36 = arith.mulf %34, %35 : vector<8x32xf32>
    %cst_12 = arith.constant 4.471500e-02 : f32
    %37 = vector.broadcast %cst_12 : f32 to vector<8x32xf32>
    %38 = arith.mulf %37, %36 : vector<8x32xf32>
    %39 = arith.addf %34, %38 : vector<8x32xf32>
    %cst_13 = arith.constant 0.797884583 : f32
    %40 = vector.broadcast %cst_13 : f32 to vector<8x32xf32>
    %41 = arith.mulf %40, %39 : vector<8x32xf32>
    %42 = math.tanh %41 : vector<8x32xf32>
    %cst_14 = arith.constant 1.000000e+00 : f32
    %43 = vector.broadcast %cst_14 : f32 to vector<8x32xf32>
    %44 = arith.addf %43, %42 : vector<8x32xf32>
    %cst_15 = arith.constant 5.000000e-01 : f32
    %45 = vector.broadcast %cst_15 : f32 to vector<8x32xf32>
    %46 = arith.mulf %45, %44 : vector<8x32xf32>
    %47 = arith.mulf %34, %46 : vector<8x32xf32>
    %48 = vector.shape_cast %47 : vector<8x32xf32> to vector<1x8x32xf32>
    %49 = vector.shape_cast %8 : vector<1x32xf32> to vector<1x1x32xf32>
    %50 = vector.broadcast %49 : vector<1x1x32xf32> to vector<1x8x32xf32>
    %51 = arith.mulf %48, %50 : vector<1x8x32xf32>
    %cst_16 = arith.constant dense<0.000000e+00> : vector<1x8xf32>
    %52 = vector.multi_reduction <add>, %51, %cst_16 [2] : vector<1x8x32xf32> to vector<1x8xf32>
    %c0_17 = arith.constant 0 : index
    %53 = memref.load %arg6[%c0_17] : memref<1xf32, #tpu.memory_space<smem>>
    %54 = vector.broadcast %53 : f32 to vector<1x8xf32>
    %55 = arith.addf %52, %54 : vector<1x8xf32>
    %c0_18 = arith.constant 0 : index
    %c0_19 = arith.constant 0 : index
    %c0_20 = arith.constant 0 : index
    %56 = vector.load %arg3[%c0_18, %c0_19, %c0_20] : memref<1x1x8xf32, #tpu.memory_space<vmem>>, vector<1x1x8xf32>
    %57 = vector.shape_cast %56 : vector<1x1x8xf32> to vector<1x8xf32>
    %cst_21 = arith.constant 0.000000e+00 : f32
    %58 = vector.broadcast %cst_21 : f32 to vector<1x8xf32>
    %59 = arith.cmpf oeq, %57, %58 : vector<1x8xf32>
    %cst_22 = arith.constant -1.000000e+30 : f32
    %60 = vector.broadcast %cst_22 : f32 to vector<1x8xf32>
    %61 = arith.select %59, %60, %55 : vector<1x8xi1>, vector<1x8xf32>
    %c0_23 = arith.constant 0 : index
    %c0_24 = arith.constant 0 : index
    %62 = vector.load %arg8[%c0_23, %c0_24] : memref<1x1xf32, #tpu.memory_space<vmem>>, vector<1x1xf32>
    %cst_25 = arith.constant dense<0xFF800000> : vector<1xf32>
    %63 = vector.multi_reduction <maximumf>, %61, %cst_25 [1] : vector<1x8xf32> to vector<1xf32>
    %64 = vector.shape_cast %63 : vector<1xf32> to vector<1x1xf32>
    %65 = arith.maximumf %62, %64 : vector<1x1xf32>
    %66 = arith.subf %62, %65 : vector<1x1xf32>
    %67 = math.exp %66 : vector<1x1xf32>
    %68 = vector.broadcast %65 : vector<1x1xf32> to vector<1x8xf32>
    %69 = arith.subf %61, %68 : vector<1x8xf32>
    %70 = math.exp %69 : vector<1x8xf32>
    %c0_26 = arith.constant 0 : index
    %c0_27 = arith.constant 0 : index
    %71 = vector.load %arg9[%c0_26, %c0_27] : memref<1x1xf32, #tpu.memory_space<vmem>>, vector<1x1xf32>
    %72 = arith.mulf %67, %71 : vector<1x1xf32>
    %cst_28 = arith.constant dense<0.000000e+00> : vector<1xf32>
    %73 = vector.multi_reduction <add>, %70, %cst_28 [1] : vector<1x8xf32> to vector<1xf32>
    %74 = vector.shape_cast %73 : vector<1xf32> to vector<1x1xf32>
    %75 = arith.addf %72, %74 : vector<1x1xf32>
    %c0_29 = arith.constant 0 : index
    %c0_30 = arith.constant 0 : index
    %76 = vector.load %arg9[%c0_29, %c0_30] : memref<1x1xf32, #tpu.memory_space<vmem>>, vector<1x1xf32>
    tpu.vector_store %arg9[%c0_29, %c0_30], %75 {strides = array<i32>} : memref<1x1xf32, #tpu.memory_space<vmem>>, vector<1x1xf32>,
    %c0_31 = arith.constant 0 : index
    %c0_32 = arith.constant 0 : index
    %77 = vector.load %arg10[%c0_31, %c0_32] : memref<1x32xf32, #tpu.memory_space<vmem>>, vector<1x32xf32>
    %78 = vector.broadcast %67 : vector<1x1xf32> to vector<1x32xf32>
    %79 = arith.mulf %78, %77 : vector<1x32xf32>
    %80 = vector.shape_cast %70 : vector<1x8xf32> to vector<1x8x1xf32>
    %81 = vector.broadcast %80 : vector<1x8x1xf32> to vector<1x8x32xf32>
    %82 = arith.mulf %81, %3 : vector<1x8x32xf32>
    %cst_33 = arith.constant dense<0.000000e+00> : vector<1x32xf32>
    %83 = vector.multi_reduction <add>, %82, %cst_33 [1] : vector<1x8x32xf32> to vector<1x32xf32>
    %84 = arith.addf %79, %83 : vector<1x32xf32>
    %c0_34 = arith.constant 0 : index
    %c0_35 = arith.constant 0 : index
    %85 = vector.load %arg10[%c0_34, %c0_35] : memref<1x32xf32, #tpu.memory_space<vmem>>, vector<1x32xf32>
    tpu.vector_store %arg10[%c0_34, %c0_35], %84 {strides = array<i32>} : memref<1x32xf32, #tpu.memory_space<vmem>>, vector<1x32xf32>,
    %c0_36 = arith.constant 0 : index
    %c0_37 = arith.constant 0 : index
    %86 = vector.load %arg8[%c0_36, %c0_37] : memref<1x1xf32, #tpu.memory_space<vmem>>, vector<1x1xf32>
    tpu.vector_store %arg8[%c0_36, %c0_37], %65 {strides = array<i32>} : memref<1x1xf32, #tpu.memory_space<vmem>>, vector<1x1xf32>,
    %c0_i32_38 = arith.constant 0 : i32
    %87 = arith.cmpi eq, %arg1, %c0_i32_38 : i32
    %88 = arith.extui %87 : i1 to i32
    %c0_i32_39 = arith.constant 0 : i32
    %89 = arith.cmpi ne, %88, %c0_i32_39 : i32
    scf.if %89 {
      %c0_40 = arith.constant 0 : index
      %c0_41 = arith.constant 0 : index
      %90 = vector.load %arg9[%c0_40, %c0_41] : memref<1x1xf32, #tpu.memory_space<vmem>>, vector<1x1xf32>
      %91 = tpu.reciprocal %90 {approx = true} : vector<1x1xf32> -> vector<1x1xf32>
      %c0_42 = arith.constant 0 : index
      %c0_43 = arith.constant 0 : index
      %92 = vector.load %arg9[%c0_42, %c0_43] : memref<1x1xf32, #tpu.memory_space<vmem>>, vector<1x1xf32>
      %93 = arith.mulf %92, %91 : vector<1x1xf32>
      %cst_44 = arith.constant 2.000000e+00 : f32
      %94 = vector.broadcast %cst_44 : f32 to vector<1x1xf32>
      %95 = arith.subf %94, %93 : vector<1x1xf32>
      %96 = arith.mulf %91, %95 : vector<1x1xf32>
      %c0_45 = arith.constant 0 : index
      %c0_46 = arith.constant 0 : index
      %97 = vector.load %arg10[%c0_45, %c0_46] : memref<1x32xf32, #tpu.memory_space<vmem>>, vector<1x32xf32>
      %98 = vector.broadcast %96 : vector<1x1xf32> to vector<1x32xf32>
      %99 = arith.mulf %97, %98 : vector<1x32xf32>
      %c0_47 = arith.constant 0 : index
      %c0_48 = arith.constant 0 : index
      %c0_49 = arith.constant 0 : index
      %100 = vector.load %arg7[%c0_47, %c0_48, %c0_49] : memref<1x1x32xf32, #tpu.memory_space<vmem>>, vector<1x1x32xf32>
      %101 = vector.shape_cast %100 : vector<1x1x32xf32> to vector<1x32xf32>
      %102 = vector.shape_cast %99 : vector<1x32xf32> to vector<1x1x32xf32>
      tpu.vector_store %arg7[%c0_47, %c0_48, %c0_49], %102 {strides = array<i32>} : memref<1x1x32xf32, #tpu.memory_space<vmem>>, vector<1x1x32xf32>,
    } else {
    }
    return
  }
  func.func @transform_0(%arg0: i32, %arg1: i32) -> (i32, i32, i32) {
    %c0_i32 = arith.constant 0 : i32
    %c0_i32_0 = arith.constant 0 : i32
    return %arg0, %arg1, %c0_i32 : i32, i32, i32
  }
  func.func @transform_1(%arg0: i32, %arg1: i32) -> (i32, i32, i32) {
    %c0_i32 = arith.constant 0 : i32
    %c0_i32_0 = arith.constant 0 : i32
    return %arg0, %c0_i32, %arg1 : i32, i32, i32
  }
  func.func @transform_2(%arg0: i32, %arg1: i32) -> (i32, i32) {
    %c0_i32 = arith.constant 0 : i32
    %c0_i32_0 = arith.constant 0 : i32
    %c0_i32_1 = arith.constant 0 : i32
    return %c0_i32, %c0_i32_0 : i32, i32
  }
  func.func @transform_3(%arg0: i32, %arg1: i32) -> (i32, i32) {
    %c0_i32 = arith.constant 0 : i32
    %c0_i32_0 = arith.constant 0 : i32
    %c0_i32_1 = arith.constant 0 : i32
    return %c0_i32, %c0_i32_0 : i32, i32
  }
  func.func @transform_4(%arg0: i32, %arg1: i32) -> i32 {
    %c0_i32 = arith.constant 0 : i32
    %c0_i32_0 = arith.constant 0 : i32
    return %c0_i32 : i32
  }
  func.func @transform_5(%arg0: i32, %arg1: i32) -> (i32, i32, i32) {
    %c0_i32 = arith.constant 0 : i32
    %c0_i32_0 = arith.constant 0 : i32
    %c0_i32_1 = arith.constant 0 : i32
    return %arg0, %c0_i32, %c0_i32_0 : i32, i32, i32
  }
}

</mosaic_0001>

<bundles_post_ra>
// kernel: tpu_custom_call.1
= control target key start
LH: loop header
LB: loop body
LE: loop exit
PB: predicated region body
PF: predicated region fallthrough
CT: control target
= control target key end

     0   :  { %s1157_s0 = inlined_call_operand.hbm [shape: f32[2,8,32], index: 0, kind: input, shape index: {}]   ;;  %s1158_s1 = inlined_call_operand.hbm [shape: f32[2,1,8], index: 1, kind: input, shape index: {}]   ;;  %s1159_s2 = inlined_call_operand.hbm [shape: bf16[32,32], index: 2, kind: input, shape index: {}]   ;;  %s1160_s3 = inlined_call_operand.vmem [shape: f32[4,32], index: 3, kind: input, shape index: {}]   ;;  %s1161_s4 = inlined_call_operand.<no memory space> [shape: f32[1], index: 4, kind: input, shape index: {}]   ;;  %s1162_s5 = inlined_call_operand.hbm [shape: f32[2,1,32], index: 5, kind: output, shape index: {}]  }
   0x1   :  { %1166 = sst [smem:[#allocation21_spill]] %s1159_s2 }
   0x2   :  { %10 = sst [smem:[#allocation5]] %s1161_s4 }
   0x3   :  { %11 = vsyncpa [#allocation7], 0 }
   0x4   :  { %13 = vsyncpa [#allocation7 + $0x1], 0 }
   0x5   :  { %14 = vsyncpa [#allocation10], 0 }
   0x6   :  { %16 = vsyncpa [#allocation10 + $0x1], 0 }
   0x7   :  { %17 = vsyncpa [#allocation8], 0 }
   0x8   :  { %19 = vsyncpa [#allocation8 + $0x1], 0  ;;  %s975_s20 = smov 0   ;;  %s977_s21 = smov 0  }
   0x9   :  { %s979_s22 = smov 0   ;;  %s981_s23 = smov 0  }
   0xa   :  { %s983_s24 = smov 0   ;;  %s985_s25 = smov 0  }
   0xb LB: > { %1167 = sst [smem:[#allocation17_spill]] %s921_s22  ;;  %s1006_s4 = sadd.s32 4294967295, %s933_s25   ;;  %s933_s25 = sphi %s985_s25, %s25_s25   ;;  %s929_s24 = sphi %s983_s24, %s1184_s24   ;;  %s925_s23 = sphi %s981_s23, %s1183_s23   ;;  %s921_s22 = sphi %s979_s22, %s1179_s22   ;;  %s917_s21 = sphi %s977_s21, %s1182_s21   ;;  %s913_s20 = sphi %s975_s20, %s1181_s20  }
   0xc   : > { %p632_p0 = scmp.ge.s32.totalorder %s933_s25, 1  ;;  %p60_p1 = scmp.eq.s32.totalorder %s1006_s4, 0 }
   0xd   : > { %p187_p2 = scmp.lt.s32.totalorder %s933_s25, 3  ;;  %s1168_s2 = sld [smem:[#allocation21_spill]] }
   0xe   : > { %s935_s30 = smov [#allocation11]   ;;  %p634_p6 = scmp.ge.s32.totalorder %s933_s25, 2 }
   0xf   : > { %p1014_p3 = pnand %p632_p0, %p187_p2  ;;  %s200_s6 = sshll.u32 %s935_s30, 4  ;;  %s201_s6 = int_to_ptr.vmem [resolvable:$true] %s200_s6 }
  0x10   : > { %s936_s7 = smov 64   ;;  %s937_s8 = smov 4  }
  0x11   : > { %p663_p4 = pneg %p1014_p3  ;;  %s631_s9 = sadd.s32 4294967294, %s933_s25  }
  0x12   : > { %s37_s10 = sadd.s32 1, %s929_s24  ;;  %s46_s11 = sadd.s32 1, %s921_s22 }
  0x13   : > { %s198_s28 = sshll.u32 %s1168_s2, 4  ;;  %p664_p5 = pnand %p663_p4, %p60_p1  ;;  %s199_s28 = int_to_ptr.hbm [resolvable:$true] %s198_s28 }
  0x14   : > { %p39_p7 = scmp.ge.s32.totalorder %s37_s10, 2  ;;  %p53_p8 = scmp.ne.s32.totalorder %s921_s22, %s917_s21 }
  0x15   : > { %666 = dma.hbm_to_vmem [thread:$0]  (!%p664_p5), %s199_s28, 256, %s201_s6, [#allocation10], %s936_s7, %s936_s7, %s937_s8  }
  0x16   : > { %p54_p9 = scmp.eq.s32.totalorder %s933_s25, 0  ;;  %p59_p10 = scmp.ne.s32.totalorder %s917_s21, %s913_s20 }
  0x17   : > { %s1186_s10 = smov (%p39_p7, %s37_s10), 0  ;;  %p174_p13 = scmp.eq.s32.totalorder %s1006_s4, 1 }
  0x18   : > { %1170 = sst [smem:[#allocation18_spill]] %s1186_s10  ;;  %p1033_p11 = por %p54_p9, %p53_p8 }
  0x19   : > { %p1039_p12 = por %p60_p1, %p59_p10  ;;  %s41_s14 = ssub.s32 %s929_s24, %s1186_s10 }
  0x1a   : > { %p44_p0 = scmp.eq.s32.totalorder %s41_s14, 0  ;;  %p180_p2 = scmp.eq.s32.totalorder %s631_s9, 1 }
  0x1b   : > { %p1046_p4 = por %p174_p13, %p53_p8  ;;  %p679_p5 = scmp.lt.s32.totalorder %s933_s25, 2 }
  0x1c   : > { %s1052_s16 = scalar_select %p44_p0, %s921_s22, %s46_s11  }
  0x1d   : > { %p1054_p7 = por %p180_p2, %p59_p10  ;;  %s220_s18 = sand.u32 1, %s921_s22  }
  0x1e   : > { %1174 = sst [smem:[#allocation19_spill]] %s1052_s16  ;;  %s635_s19 = sshll.u32 %s220_s18, 3 }
  0x1f   : > { %s1175_s17 = scalar_select %p1054_p7, 1, 0 }
  0x20   : > { %s636_s26 = sshll.u32 %s929_s24, 3  ;;  %s224_s6 = scalar_lea.vmem [#allocation6], %s635_s19 }
  0x21   : > { %1176 = sst [smem:[#allocation20_spill]] %s1175_s17  ;;  %s229_s30 = scalar_lea.hbm %s1157_s0, %s636_s26 }
  0x22   : > { %s233_s7 = sshll.u32 %s224_s6, 4  ;;  %s231_s8 = sshll.u32 %s229_s30, 4  ;;  %s234_s7 = int_to_ptr.vmem [resolvable:$true] %s233_s7  ;;  %s232_s8 = int_to_ptr.hbm [resolvable:$true] %s231_s8 }
  0x23   : > { %p668_p8 = pnand %p679_p5, %p1033_p11  ;;  %s240_s9 = sand.u32 1, %s933_s25  }
  0x24   : > { %s221_s11 = scalar_lea.sflag [#allocation7], %s220_s18  ;;  %s247_s10 = scalar_lea.hbm %s1158_s1, %s929_s24 }
  0x25   : > { %670 = dma.hbm_to_vmem [thread:$0]  (!%p668_p8), %s232_s8, 128, %s234_s7, %s221_s11  }
  0x26   : > { %s243_s16 = scalar_lea.vmem [#allocation9], %s220_s18  ;;  %s249_s17 = sshll.u32 %s247_s10, 4  ;;  %s250_s17 = int_to_ptr.hbm [resolvable:$true] %s249_s17 }
  0x27   : > { %s251_s22 = sshll.u32 %s243_s16, 4  ;;  %s241_s26 = scalar_lea.sflag [#allocation10], %s240_s9  ;;  %s252_s22 = int_to_ptr.vmem [resolvable:$true] %s251_s22 }
  0x28   : > { %673 = dma.hbm_to_vmem [thread:$0]  (!%p668_p8), %s250_s17, 16, %s252_s22, %s241_s26  }
  0x29   : > { %260 = sbr.rel (%p1014_p3) target bundleno = 1220 (0x4c4), region = 40  ;;  %s1073_s12 = sand.u32 (!%p1014_p3), 1, %s917_s21  }
  0x2a   : > { %s638_s19 = sshll.u32 (!%p1014_p3), %s1073_s12, 3  ;;  %s263_s27 = scalar_lea.sflag (!%p1014_p3), [#allocation7], %s1073_s12 }
  0x2b   : > { %s266_s2 = scalar_lea.vmem (!%p1014_p3), [#allocation6], %s638_s19 }
  0x2e   : > { %896 = dma.done.wait (%p1039_p12), %s263_s27, 128  }
  0x2f   : > { %898 = vsyncadd (%p1039_p12), %s263_s27, 4294967168  ;;  %s272_s22 = sand.u32 1, %s1006_s4   ;;  %s275_s10 = scalar_lea.vmem [#allocation9], %s1073_s12 }
  0x30   : > { %s273_s29 = scalar_lea.sflag [#allocation10], %s272_s22 }
  0x31   : > { %900 = dma.done.wait (%p1039_p12), %s273_s29, 16  }
  0x32   : > { %902 = vsyncadd (%p1039_p12), %s273_s29, 4294967280 }
  0x33   : > { %904 = dma.done.wait (%p60_p1), [#allocation10], 256  }
  0x34   : > { %906 = vsyncadd (%p60_p1), [#allocation10], 4294967040  ;;  %v652_v0 = vld [vmem:[#allocation11 + $0x8] sm:$0xff]  ;;  %v651_v1 = vld [vmem:[#allocation11] sm:$0xff]  ;;  %vm341_vm0 = vcmask 261120   ;;  %v938_v10 = vmov 32.0   ;;  %v438_v63 = vlaneseq  ;;  %s522_s28 = scalar_lea.hbm %s1162_s5, %s925_s23 }
  0x35   : > { %351 = vmatpush.bf16.msra.mxu0 %v652_v0  ;;  %v1091_v2 = vld [vmem:[%s266_s2] sm:$0xff]  ;;  %v322_v4 = vld [vmem:[%s1160_s3] sm:$0xf]  ;;  %741 = vrcp.f32 %v938_v10  ;;  %v939_v49 = vmov 0   ;;  %s405_s4 = sld [smem:[#allocation5]]  ;;  %vm316_vm5 = vcmask 0  }
  0x36   : > { %v323_v3 = vpack.c.bf16 %v1091_v2, %v1091_v2  ;;  %v328_v5 = vperm.slane %v322_v4, 0  ;;  %v387_v31 = vperm.slane %v322_v4, 1  ;;  %v389_v33 = vperm.slane %v322_v4, 2  ;;  %737 = vset.pattern.permute.xlu1 %v939_v49  ;;  %738 = vset.pattern.permute.xlu2 %v939_v49  ;;  %s310_s30 = scalar_lea.vmem [#allocation12], %s1073_s12  ;;  %s526_s7 = sshll.u32 %s522_s28, 4  ;;  %s527_s7 = int_to_ptr.hbm [resolvable:$true] %s526_s7 }
  0x37   : > { %v400_v45 = vperm.slane %v322_v4, 3  ;;  %v940_v62 = vmov -inf   ;;  %v439_v0 = vand.u32 127, %v438_v63  ;;  %vm444_vm7 = vcmask 57344   ;;  %s524_s6 = sshll.u32 %s310_s30, 4  ;;  %s514_s8 = scalar_lea.sflag [#allocation8], %s1073_s12  ;;  %s525_s6 = int_to_ptr.vmem [resolvable:$true] %s524_s6 }
  0x38   : > { %317 = vst.msk [vmem:[#allocation2] sm:$0x1] %vm316_vm5, %v940_v62  ;;  %vm319_vm8 = vcmask 253952   ;;  %s857_s9 = sshra.s32 %s527_s7, 4  ;;  %s863_s26 = scalar_lea.hbm %s1162_s5, 2  ;;  %s858_s9 = int_to_ptr.hbm [resolvable:$true] %s857_s9 }
  0x39   : > { %352 = vmatpush.bf16.msra.mxu0 %v651_v1  ;;  %v408_v1 = vld [vmem:[%s275_s10] sm:$0x1]  ;;  %s859_s11 = scalar_lea.hbm %s858_s9, 1  ;;  %p864_p10 = scmp.lt.s32.totalorder %s858_s9, %s1162_s5 }
  0x3a   : > { %vm409_vm6 = vcmp.eq.f32.partialorder %v408_v1, 0.0  ;;  %p860_p1 = scmp.ne.s32.totalorder %s858_s9, %s859_s11  ;;  %p865_p11 = scmp.lt.s32.totalorder %s863_s26, %s859_s11 }
  0x3b   : > { %v742_v11 = vpop.eup %741  ;;  %v406_v50 = vstv %s405_s4 }
  0x3c   : > { %648 = vmatmul.msk.bf16.vlgmr.msra.gmra.mxu0 %vm341_vm0, %v323_v3  ;;  %v362_v12 = vmul.f32 32.0, %v742_v11  ;;  %vm366_vm1 = vweird.f32 %v742_v11  ;;  %p861_p3 = pnand %p860_p1, %p1046_p4  ;;  %p866_p12 = por %p865_p11, %p864_p10 }
  0x3e   : > { %v363_v13 = vsub.f32 1.0, %v362_v12  ;;  %p862_p9 = pneg %p861_p3 }
  0x40   : > { %v364_v14 = vmul.f32 %v742_v11, %v363_v13  ;;  %p867_p13 = pnand %p866_p12, %p862_p9 }
  0x42   : > { %v365_v15 = vadd.f32 %v742_v11, %v364_v14  ;;  %v479_v14 = vshrl.u32 %v438_v63, 7 }
  0x44   : > { %v367_v16 = vsel %vm366_vm1, %v742_v11, %v365_v15  ;;  %739 = vset.pattern.permute.xlu0 %v479_v14 }
  0xb9   : > { %v354_v6 = vpop.f32.mrf.mxu0 }
  0xba   : > { %v355_v7 = vadd.f32 %v354_v6, %v328_v5 }
  0xbc   : > { %v358_v8 = vsel %vm341_vm0, %v355_v7, 0.0 }
  0xbd   : > { %359 = vadd.xlane.f32.xlu0 %v358_v8  ;;  %v443_v8 = vld [vmem:[#allocation2] sm:$0x1] }
  0xc1   : > { %v356_v9 = vpop.f32.mrf.mxu0 }
 0x130   : > { %v360_v17 = vpop.xlane.xlu0 %359 }
 0x131   : > { %v368_v18 = vmul.f32 %v367_v16, %v360_v17 }
 0x133   : > { %v369_v19 = vsub.f32 %v355_v7, %v368_v18  ;;  %v941_v7 = vmov 0.0  }
 0x134   : > { %318 = vst.msk [vmem:[#allocation3] sm:$0x1] %vm316_vm5, %v941_v7 }
 0x135   : > { %v370_v20 = vmul.f32 %v369_v19, %v369_v19  ;;  %320 = vst.msk [vmem:[#allocation4] sm:$0x1] %vm319_vm8, %v941_v7 }
 0x137   : > { %v371_v21 = vsel %vm341_vm0, %v370_v20, 0.0 }
 0x138   : > { %372 = vadd.xlane.f32.xlu0 %v371_v21 }
 0x1ab   : > { %v373_v22 = vpop.xlane.xlu0 %372 }
 0x1ac   : > { %v374_v23 = vmul.f32 %v373_v22, %v367_v16  ;;  %v461_v22 = vld [vmem:[#allocation3] sm:$0x1] }
 0x1ae   : > { %v375_v24 = vadd.f32 1e-05, %v374_v23 }
 0x1b0   : > { %743 = vrsqrt.f32 %v375_v24  ;;  %vm382_vm3 = vweird.f32 %v375_v24 }
 0x1b6   : > { %v744_v25 = vpop.eup %743 }
 0x1b7   : > { %v377_v26 = vmul.f32 %v744_v25, %v375_v24  ;;  %vm383_vm2 = vweird.f32 %v744_v25 }
 0x1b8   : > { %vm384_vm4 = vmor %vm382_vm3, %vm383_vm2 }
 0x1b9   : > { %v378_v27 = vmul.f32 %v744_v25, %v377_v26 }
 0x1bb   : > { %v379_v28 = vmul.f32 0.5, %v378_v27 }
 0x1bd   : > { %v380_v29 = vsub.f32 1.5, %v379_v28 }
 0x1bf   : > { %v381_v30 = vmul.f32 %v744_v25, %v380_v29 }
 0x1c1   : > { %v385_v32 = vsel %vm384_vm4, %v744_v25, %v381_v30 }
 0x1c2   : > { %v386_v34 = vmul.f32 %v385_v32, %v369_v19 }
 0x1c4   : > { %v388_v35 = vmul.f32 %v387_v31, %v386_v34 }
 0x1c6   : > { %v390_v36 = vadd.f32 %v389_v33, %v388_v35 }
 0x1c8   : > { %v391_v37 = vmul.f32 %v390_v36, %v390_v36 }
 0x1ca   : > { %v392_v38 = vmul.f32 %v391_v37, %v390_v36 }
 0x1cc   : > { %v393_v39 = vmul.f32 0.044715, %v392_v38 }
 0x1ce   : > { %v394_v40 = vadd.f32 %v393_v39, %v390_v36 }
 0x1d0   : > { %v395_v41 = vmul.f32 0.7978846, %v394_v40  ;;  %v469_v40 = vld [vmem:[#allocation4] sm:$0x1] }
 0x1d2   : > { %745 = vtanh.f32 %v395_v41 }
 0x1d8   : > { %v746_v42 = vpop.eup %745 }
 0x1d9   : > { %v397_v43 = vadd.f32 1.0, %v746_v42 }
 0x1db   : > { %v398_v44 = vmul.f32 0.5, %v397_v43 }
 0x1dd   : > { %v399_v46 = vmul.f32 %v398_v44, %v390_v36 }
 0x1df   : > { %v401_v47 = vmul.f32 %v400_v45, %v399_v46 }
 0x1e1   : > { %v402_v48 = vsel %vm341_vm0, %v401_v47, 0.0 }
 0x1e2   : > { %403 = vadd.xlane.f32.xlu1 %v402_v48 }
 0x255   : > { %v404_v51 = vpop.xlane.xlu1 %403 }
 0x256   : > { %v407_v52 = vadd.f32 %v406_v50, %v404_v51 }
 0x258   : > { %v411_v53 = vperm.slane %v407_v52, 0  ;;  %v412_v54 = vperm.slane %v407_v52, 1  ;;  %v413_v55 = vperm.slane %v407_v52, 2  ;;  %v414_v56 = vperm.slane %v407_v52, 3 }
 0x259   : > { %v415_v57 = vperm.slane %v407_v52, 4  ;;  %v416_v58 = vperm.slane %v407_v52, 5  ;;  %v417_v59 = vperm.slane %v407_v52, 6  ;;  %v418_v60 = vperm.slane %v407_v52, 7 }
 0x25a   : > { %419 = vst [vmem:[#allocation1] ss:$9 sm:$0xff] %v411_v53 }
 0x25b   : > { %421 = vst [vmem:[#allocation1 + $0x1] ss:$9 sm:$0xff] %v412_v54 }
 0x25c   : > { %423 = vst [vmem:[#allocation1 + $0x2] ss:$9 sm:$0xff] %v413_v55 }
 0x25d   : > { %425 = vst [vmem:[#allocation1 + $0x3] ss:$9 sm:$0xff] %v414_v56 }
 0x25e   : > { %427 = vst [vmem:[#allocation1 + $0x4] ss:$9 sm:$0xff] %v415_v57 }
 0x25f   : > { %429 = vst [vmem:[#allocation1 + $0x5] ss:$9 sm:$0xff] %v416_v58 }
 0x260   : > { %431 = vst [vmem:[#allocation1 + $0x6] ss:$9 sm:$0xff] %v417_v59 }
 0x261   : > { %433 = vst [vmem:[#allocation1 + $0x7] ss:$9 sm:$0xff] %v418_v60 }
 0x268   : > { %v434_v61 = vld [vmem:[#allocation1] sm:$0xff] }
 0x269   : > { %436 = vperm.xlu1 %737, %v434_v61  }
 0x2db   : > { %v437_v3 = vpop.permute.xlu1 %436 }
 0x2dc   : > { %v440_v4 = vperm.slane %v437_v3, %v439_v0 }
 0x2de   : > { %v442_v5 = vsel %vm409_vm6, -1e+30, %v440_v4 }
 0x2df   : > { %v445_v6 = vsel %vm444_vm7, %v442_v5, -inf }
 0x2e0   : > { %446 = vmax.xlane.f32.xlu2 %v445_v6 }
 0x353   : > { %v447_v9 = vpop.xlane.xlu2 %446 }
 0x354   : > { %v448_v10 = vmax.f32 %v443_v8, %v447_v9 }
 0x356   : > { %v449_v11 = vsub.f32 %v443_v8, %v448_v10  ;;  %495 = vst.msk [vmem:[#allocation2] sm:$0x1] %vm316_vm5, %v448_v10  ;;  %454 = vperm.xlu2 %738, %v448_v10  }
 0x358   : > { %v450_v12 = vmul.f32 1.442695, %v449_v11 }
 0x35a   : > { %747 = vpow2.f32 %v450_v12 }
 0x360   : > { %v748_v13 = vpop.eup %747 }
 0x361   : > { %472 = vperm.xlu2 %738, %v748_v13   ;;  %v462_v23 = vmul.f32 %v748_v13, %v461_v22 }
 0x3b0   : > { %v455_v15 = vpop.permute.xlu2 %454 }
 0x3b1   : > { %v457_v16 = vperm.slane %v455_v15, 0 }
 0x3b3   : > { %v458_v17 = vsub.f32 %v442_v5, %v457_v16 }
 0x3b5   : > { %v459_v18 = vmul.f32 1.442695, %v458_v17 }
 0x3b7   : > { %749 = vpow2.f32 %v459_v18 }
 0x3bb   : > { %v473_v36 = vpop.permute.xlu2 %472 }
 0x3bc   : > { %v475_v38 = vperm.slane %v473_v36, 0 }
 0x3bd   : > { %v750_v19 = vpop.eup %749 }
 0x3be   : > { %v463_v20 = vsel %vm444_vm7, %v750_v19, 0.0  ;;  %v477_v21 = vperm.slane %v750_v19, 0  ;;  %v476_v42 = vmul.f32 %v475_v38, %v469_v40 }
 0x3bf   : > { %464 = vadd.xlane.f32.xlu0 %v463_v20 }
 0x3d3   : > { %482 = vperm.xlu0 %739, %v477_v21  }
 0x3db   : > { %740 = vset.pattern.permute.xlu0 %v939_v49 }
 0x432   : > { %v465_v24 = vpop.xlane.xlu0 %464 }
 0x433   : > { %v466_v25 = vadd.f32 %v465_v24, %v462_v23 }
 0x435   : > { %468 = vst.msk [vmem:[#allocation3] sm:$0x1] %vm316_vm5, %v466_v25 }
 0x43c   : > { %v499_v26 = vld [vmem:[#allocation3] sm:$0x1] }
 0x43d   : > { %751 = vrcp.f32 %v499_v26 }
 0x443   : > { %v752_v27 = vpop.eup %751 }
 0x444   : > { %v501_v28 = vmul.f32 %v752_v27, %v499_v26 }
 0x445   : > { %v483_v29 = vpop.permute.xlu0 %482 }
 0x446   : > { %v484_v30 = vmul.f32 %v483_v29, %v1091_v2  ;;  %v502_v31 = vsub.f32 2.0, %v501_v28 }
 0x448   : > { %v485_v32 = vsel %vm341_vm0, %v484_v30, 0.0  ;;  %v503_v33 = vmul.f32 %v752_v27, %v502_v31 }
 0x449   : > { %v486_v34 = vrot.slane %v485_v32, 4 }
 0x44a   : > { %507 = vperm.xlu1 %737, %v503_v33  }
 0x44b   : > { %v487_v35 = vadd.f32 %v486_v34, %v485_v32 }
 0x44d   : > { %v488_v37 = vrot.slane %v487_v35, 2 }
 0x44f   : > { %v489_v39 = vadd.f32 %v488_v37, %v487_v35 }
 0x451   : > { %v490_v41 = vrot.slane %v489_v39, 1 }
 0x453   : > { %v491_v43 = vadd.f32 %v490_v41, %v489_v39 }
 0x455   : > { %v492_v44 = vadd.f32 %v491_v43, %v476_v42 }
 0x457   : > { %494 = vst.msk [vmem:[#allocation4] sm:$0x1] %vm319_vm8, %v492_v44 }
 0x45e   : > { %v504_v46 = vld [vmem:[#allocation4] sm:$0x1] }
 0x4bc   : > { %v508_v2 = vpop.permute.xlu1 %507 }
 0x4bd   : > { %v510_v45 = vperm.slane %v508_v2, 0 }
 0x4bf   : > { %v511_v47 = vmul.f32 %v510_v45, %v504_v46 }
 0x4c1   : > { %512 = vst.msk [vmem:[%s310_s30] sm:$0x1] %vm319_vm8, %v511_v47 }
 0x4c2   : > { %870 = shalt.err (!%p867_p13)
}
 0x4c3   : > { %661 = dma.vmem_to_hbm [thread:$0]  (%p1046_p4), %s525_s6, 16, %s527_s7, %s514_s8  }
 0x4c4 PF: > { %s538_s2 = sand.u32 1, %s913_s20   ;;  %p675_p0 = pnand %p634_p6, %p1054_p7 }
 0x4c5   : > { %s539_s22 = scalar_lea.sflag [#allocation8], %s538_s2 }
 0x4c6   : > { %p676_p2 = pneg %p675_p0 }
 0x4c8   : > { %908 = dma.done.wait (%p676_p2), %s539_s22, 16  }
 0x4c9   : > { %910 = vsyncadd (%p676_p2), %s539_s22, 4294967280  ;;  %s25_s25 = sadd.s32 1, %s933_s25   ;;  %s1178_s29 = sld [smem:[#allocation17_spill]] }
 0x4ca   : > { %p22_p5 = scmp.ge.s32.totalorder %s25_s25, 4   ;;  %s1179_s22 = sld [smem:[#allocation19_spill]] }
 0x4cb   : > { %s1180_s15 = sld [smem:[#allocation18_spill]]  ;;  %s1181_s20 = smov %s917_s21 }
 0x4cc   : > { %s1183_s23 = smov %s929_s24 }
 0x4cd   :  { %24 = sbr.rel (!%p22_p5) target bundleno = 11 (0xb), region = 117 }
 0x4cf   : > { %s1182_s21 = smov %s1178_s29 }
 0x4d1   : > { %s1184_s24 = smov %s1180_s15 }
 0x4d2   :  { %544 = vsyncpa [#allocation7], 1 }
 0x4d3   :  { %546 = vsyncpa [#allocation7 + $0x1], 1 }
 0x4d4   :  { %547 = vsyncpa [#allocation10], 1 }
 0x4d5   :  { %549 = vsyncpa [#allocation10 + $0x1], 1 }
 0x4d6   :  { %550 = vsyncpa [#allocation8], 1 }
 0x4d7   :  { %552 = vsyncpa [#allocation8 + $0x1], 1 }

</bundles_post_ra>
